<compile_context>
chip_gen: v5e
topology: v5e:2x2
jax: 0.10.0
libtpu: 0.0.40
codegen_flags: <defaults>
</compile_context>

<pallas_src>
import math
from dataclasses import dataclass
from enum import Enum

import jax
import jax.numpy as jnp
import numpy as np
from jax import lax
from jax.experimental import pallas as pl
from jax.experimental.pallas import tpu as pltpu


# ----------------------------------------------------------------------------
# Deterministic center initialization (faithful port of init_centers)
# ----------------------------------------------------------------------------
def init_centers(radius: float, n_features: int, n_classes: int) -> jnp.ndarray:
    centers = np.zeros((n_classes, n_features), dtype=np.float64)
    centers[0, 0] = 1.0
    for c in range(1, n_classes):
        for d in range(c):
            numerator = 1.0 + np.dot(centers[c, :], centers[d, :]) * (n_classes - 1)
            denominator = centers[d, d] * (n_classes - 1)
            centers[c, d] = -numerator / denominator
        remaining_norm = 1.0 - np.linalg.norm(centers[c, :]) ** 2
        centers[c, c] = np.sqrt(np.abs(remaining_norm))
    centers *= radius
    return jnp.asarray(centers, dtype=jnp.float32)


class GaussianMode(Enum):
    SQR_DISTANCES = "sqr_distances"
    LOG_LIKELIHOODS = "log_likelihoods"
    LOG_POSTERIORS = "log_posteriors"
    BOTH = "both"


@dataclass
class GaussianResult:
    log_likelihoods: jnp.ndarray
    log_posteriors: jnp.ndarray


# ----------------------------------------------------------------------------
# Pallas kernel: compute in (C, tm) lane-dense layout, store (tm, C) tiles.
# ----------------------------------------------------------------------------
def _make_kernel(norm_constant: float, need_sqd: bool, need_ll: bool, need_lp: bool):
    def kernel(x_ref, cneg2_ref, csq_ref, *out_refs):
        x = x_ref[...].astype(jnp.float32)        # (tm, D) — cast in VMEM only
        c_neg2 = cneg2_ref[...]                   # (C, D)  == -2 * centers
        c_sq = csq_ref[...]                       # (C, 1)  == ||c||^2

        # -2 x.c with batch on the lane axis (MXU, f32 accumulate).   (C, tm)
        xc2_t = lax.dot_general(
            c_neg2, x,
            dimension_numbers=(((1,), (1,)), ((), ())),
            preferred_element_type=jnp.float32)

        # ||x||^2 produced directly in the lane-major (1, tm) layout via a
        # cheap ones-row MXU pass (no cross-layout relayout needed).
        ones_row = jnp.ones((1, x.shape[1]), jnp.float32)
        x_sq_t = lax.dot_general(
            ones_row, x * x,
            dimension_numbers=(((1,), (1,)), ((), ())),
            preferred_element_type=jnp.float32)                       # (1, tm)

        # Clamp: decomposition can go slightly negative by cancellation.
        sqd_t = jnp.maximum(xc2_t + c_sq + x_sq_t, 0.0)               # (C, tm)

        idx = 0
        if need_sqd:
            out_refs[idx][...] = sqd_t.T                              # (tm, C)
            idx += 1
        if need_ll or need_lp:
            ll_t = -norm_constant - 0.5 * sqd_t                       # (C, tm)
            if need_ll:
                out_refs[idx][...] = ll_t.T
                idx += 1
            if need_lp:
                # logsumexp over classes == sublane (axis 0) reduction.
                m = jnp.max(ll_t, axis=0, keepdims=True)              # (1, tm)
                lse = m + jnp.log(jnp.sum(jnp.exp(ll_t - m), axis=0, keepdims=True))
                out_refs[idx][...] = (ll_t - lse).T
                idx += 1

    return kernel


# ----------------------------------------------------------------------------
# Tiling / wrapper
# ----------------------------------------------------------------------------
_VMEM_LIMIT_BYTES = 32 * 1024 * 1024    # safe on v5e / v6e / v7x
_VMEM_BUDGET_BYTES = 24 * 1024 * 1024   # leave headroom for compiler scratch


def _round_up(a: int, b: int) -> int:
    return (a + b - 1) // b * b


def _choose_tile(N: int, per_row_bytes: int, budget_bytes: int, max_tile: int) -> int:
    """128-aligned batch tile, capped by the VMEM budget, >=2 steps for big N."""
    cap = max(128, (budget_bytes // max(per_row_bytes, 1)) // 128 * 128)
    tm = max(128, min((max_tile // 128) * 128, cap))
    n128 = _round_up(max(N, 1), 128)
    if n128 <= tm and N <= 1024:
        return n128                         # tiny problem: one small step
    # Enough work: keep at least 2 grid steps so v7x megacore can split it.
    return max(128, min(tm, _round_up(pl.cdiv(N, 2), 128)))


def max_mahalanobis_forward(x: jnp.ndarray, centers: jnp.ndarray,
                            mode: GaussianMode = GaussianMode.BOTH,
                            *, max_tile: int = 8192):
    """Mode-aware forward. Returns what the PyTorch module's forward returns."""
    N, D = x.shape
    C, Dc = centers.shape
    assert D == Dc

    need_sqd = mode is GaussianMode.SQR_DISTANCES
    need_ll = mode in (GaussianMode.LOG_LIKELIHOODS, GaussianMode.BOTH)
    need_lp = mode in (GaussianMode.LOG_POSTERIORS, GaussianMode.BOTH)
    n_out = int(need_sqd) + int(need_ll) + int(need_lp)

    # Hoisted per-center constants (computed once, resident across the grid).
    centers = centers.astype(jnp.float32)
    c_neg2 = -2.0 * centers                                     # (C, D)
    c_sq = jnp.sum(centers * centers, axis=1, keepdims=True)    # (C, 1)

    # VMEM footprint per batch row (lane-padded to 128 in VMEM), double-buffered
    # x + double-buffered (tm, C) f32 outputs + in-kernel f32 temporaries.
    x_item = jnp.dtype(x.dtype).itemsize
    x_row = _round_up(D, 128) * x_item
    out_row = _round_up(C, 128) * 4
    temp_row = _round_up(D, 128) * 4 + 8 * _round_up(C, 8) * 4
    per_row = 2 * x_row + 2 * n_out * out_row + temp_row

    tm = _choose_tile(N, per_row, _VMEM_BUDGET_BYTES, max_tile)
    grid = (pl.cdiv(N, tm),)                 # ragged N: partial last block (no pad copy)

    norm_constant = D / 2.0 * math.log(2.0 * math.pi)

    out_shapes = tuple(jax.ShapeDtypeStruct((N, C), jnp.float32) for _ in range(n_out))
    out_specs = tuple(pl.BlockSpec((tm, C), lambda i: (i, 0)) for _ in range(n_out))

    outs = pl.pallas_call(
        _make_kernel(norm_constant, need_sqd, need_ll, need_lp),
        out_shape=out_shapes,
        grid_spec=pltpu.PrefetchScalarGridSpec(
            num_scalar_prefetch=0,
            grid=grid,
            in_specs=[
                pl.BlockSpec((tm, D), lambda i: (i, 0)),   # x batch tile (native dtype)
                pl.BlockSpec((C, D), lambda i: (0, 0)),    # -2*centers (resident)
                pl.BlockSpec((C, 1), lambda i: (0, 0)),    # ||c||^2    (resident)
            ],
            out_specs=out_specs,
        ),
        compiler_params=pltpu.CompilerParams(
            dimension_semantics=("parallel",),
            vmem_limit_bytes=_VMEM_LIMIT_BYTES,
        ),
    )(x, c_neg2, c_sq)

    outs = list(outs)
    results = {}
    i = 0
    if need_sqd:
        results["sqd"] = outs[i]; i += 1
    if need_ll:
        results["ll"] = outs[i]; i += 1
    if need_lp:
        results["lp"] = outs[i]; i += 1

    if mode is GaussianMode.SQR_DISTANCES:
        return results["sqd"]
    if mode is GaussianMode.LOG_LIKELIHOODS:
        return results["ll"]
    if mode is GaussianMode.LOG_POSTERIORS:
        return results["lp"]
    assert mode is GaussianMode.BOTH
    return GaussianResult(log_likelihoods=results["ll"], log_posteriors=results["lp"])


class MaxMahalanobis:
    """Thin host-side wrapper mirroring the PyTorch module's forward."""

    def __init__(self, radius: float, n_features: int, n_classes: int):
        self.centers = init_centers(radius, n_features, n_classes)
        self.out_channels = n_classes

    def __call__(self, x: jnp.ndarray, mode: GaussianMode = GaussianMode.BOTH):
        return max_mahalanobis_forward(x, self.centers, mode)


# ----------------------------------------------------------------------------
# Pure-JAX reference (mirrors the PyTorch forward) for sanity checks.
# ----------------------------------------------------------------------------
def _reference(x, centers):
    x = x.astype(jnp.float32)
    diff = x[:, None, :] - centers[None, :, :]
    sqd = jnp.sum(diff * diff, axis=2)
    d = x.shape[1]
    ll = -(d / 2.0) * math.log(2.0 * math.pi) - 0.5 * sqd
    lp = ll - jax.scipy.special.logsumexp(ll, axis=1, keepdims=True)
    return sqd, ll, lp


if __name__ == "__main__":
    radius = 10.0
    n_features = 32
    n_classes = 8
    batch = 8

    module = MaxMahalanobis(radius, n_features, n_classes)
    centers = module.centers                                    # (8, 32)

    key = jax.random.PRNGKey(0)
    x = jax.random.normal(key, (batch, n_features), dtype=jnp.float32)  # (8, 32)

    # All four modes on the small single-step path.
    sqd = module(x, GaussianMode.SQR_DISTANCES)
    ll = module(x, GaussianMode.LOG_LIKELIHOODS)
    lp = module(x, GaussianMode.LOG_POSTERIORS)
    both = module(x, GaussianMode.BOTH)
    jax.block_until_ready((sqd, ll, lp, both.log_likelihoods, both.log_posteriors))

    sqd_r, ll_r, lp_r = _reference(x, centers)
    assert bool(jnp.allclose(sqd, sqd_r, atol=1e-3, rtol=1e-4))
    assert bool(jnp.allclose(ll, ll_r, atol=1e-3, rtol=1e-4))
    assert bool(jnp.allclose(lp, lp_r, atol=1e-3, rtol=1e-4))
    assert bool(jnp.allclose(both.log_likelihoods, ll_r, atol=1e-3, rtol=1e-4))
    assert bool(jnp.allclose(both.log_posteriors, lp_r, atol=1e-3, rtol=1e-4))

    # Exercise the multi-step grid + ragged (partial last block) path.
    x2 = jax.random.normal(jax.random.PRNGKey(1), (300, n_features), dtype=jnp.float32)
    both2 = max_mahalanobis_forward(x2, centers, GaussianMode.BOTH, max_tile=128)
    sqd2 = max_mahalanobis_forward(x2, centers, GaussianMode.SQR_DISTANCES, max_tile=128)
    jax.block_until_ready((both2.log_likelihoods, both2.log_posteriors, sqd2))
    sqd2_r, ll2_r, lp2_r = _reference(x2, centers)
    assert bool(jnp.allclose(sqd2, sqd2_r, atol=1e-3, rtol=1e-4))
    assert bool(jnp.allclose(both2.log_likelihoods, ll2_r, atol=1e-3, rtol=1e-4))
    assert bool(jnp.allclose(both2.log_posteriors, lp2_r, atol=1e-3, rtol=1e-4))

    print("KERNEL_OK")
</pallas_src>

<mosaic_0001>
module attributes {stable_mosaic.version = 11 : i64} {
  func.func @kernel(%arg0: i32, %arg1: memref<128x32xf32, #tpu.memory_space<vmem>>, %arg2: memref<8x32xf32, #tpu.memory_space<vmem>>, %arg3: memref<8x1xf32, #tpu.memory_space<vmem>>, %arg4: memref<128x8xf32, #tpu.memory_space<vmem>>) attributes {dimension_semantics = [#tpu.dimension_semantics<parallel>], iteration_bounds = array<i64: 1>, scalar_prefetch = 0 : i64, scratch_operands = 0 : i64, tpu.core_type = #tpu.core_type<tc>, window_params = [{transform_indices = @transform_0, window_bounds = array<i64: 128, 32>}, {pipeline_mode = #tpu.pipeline_mode<synchronous>, transform_indices = @transform_1, window_bounds = array<i64: 8, 32>}, {pipeline_mode = #tpu.pipeline_mode<synchronous>, transform_indices = @transform_2, window_bounds = array<i64: 8, 1>}, {transform_indices = @transform_3, window_bounds = array<i64: 128, 8>}]} {
    %c0 = arith.constant 0 : index
    %c0_0 = arith.constant 0 : index
    %0 = vector.load %arg1[%c0, %c0_0] : memref<128x32xf32, #tpu.memory_space<vmem>>, vector<128x32xf32>
    %c0_1 = arith.constant 0 : index
    %c0_2 = arith.constant 0 : index
    %1 = vector.load %arg2[%c0_1, %c0_2] : memref<8x32xf32, #tpu.memory_space<vmem>>, vector<8x32xf32>
    %c0_3 = arith.constant 0 : index
    %c0_4 = arith.constant 0 : index
    %2 = vector.load %arg3[%c0_3, %c0_4] : memref<8x1xf32, #tpu.memory_space<vmem>>, vector<8x1xf32>
    %cst = arith.constant dense<0.000000e+00> : vector<8x128xf32>
    %3 = tpu.matmul %1, %0, %cst {dimension_numbers = #tpu.dot_dimension_numbers<[1], [1], [0], [0], [0, 0, 1, 0], [], []>} : vector<8x32xf32>, vector<128x32xf32>, vector<8x128xf32> -> vector<8x128xf32>
    %cst_5 = arith.constant 1.000000e+00 : f32
    %4 = vector.broadcast %cst_5 : f32 to vector<1x32xf32>
    %5 = arith.mulf %0, %0 : vector<128x32xf32>
    %cst_6 = arith.constant dense<0.000000e+00> : vector<1x128xf32>
    %6 = tpu.matmul %4, %5, %cst_6 {dimension_numbers = #tpu.dot_dimension_numbers<[1], [1], [0], [0], [0, 0, 1, 0], [], []>} : vector<1x32xf32>, vector<128x32xf32>, vector<1x128xf32> -> vector<1x128xf32>
    %7 = vector.broadcast %2 : vector<8x1xf32> to vector<8x128xf32>
    %8 = arith.addf %3, %7 : vector<8x128xf32>
    %9 = vector.broadcast %6 : vector<1x128xf32> to vector<8x128xf32>
    %10 = arith.addf %8, %9 : vector<8x128xf32>
    %cst_7 = arith.constant 0.000000e+00 : f32
    %11 = vector.broadcast %cst_7 : f32 to vector<8x128xf32>
    %12 = arith.maximumf %10, %11 : vector<8x128xf32>
    %13 = tpu.transpose %12, [1, 0] : vector<8x128xf32> -> vector<128x8xf32>
    %c0_8 = arith.constant 0 : index
    %c0_9 = arith.constant 0 : index
    %14 = vector.load %arg4[%c0_8, %c0_9] : memref<128x8xf32, #tpu.memory_space<vmem>>, vector<128x8xf32>
    tpu.vector_store %arg4[%c0_8, %c0_9], %13 {strides = array<i32>} : memref<128x8xf32, #tpu.memory_space<vmem>>, vector<128x8xf32>,
    return
  }
  func.func @transform_0(%arg0: i32) -> (i32, i32) {
    %c0_i32 = arith.constant 0 : i32
    %c0_i32_0 = arith.constant 0 : i32
    return %arg0, %c0_i32 : i32, i32
  }
  func.func @transform_1(%arg0: i32) -> (i32, i32) {
    %c0_i32 = arith.constant 0 : i32
    %c0_i32_0 = arith.constant 0 : i32
    %c0_i32_1 = arith.constant 0 : i32
    return %c0_i32, %c0_i32_0 : i32, i32
  }
  func.func @transform_2(%arg0: i32) -> (i32, i32) {
    %c0_i32 = arith.constant 0 : i32
    %c0_i32_0 = arith.constant 0 : i32
    %c0_i32_1 = arith.constant 0 : i32
    return %c0_i32, %c0_i32_0 : i32, i32
  }
  func.func @transform_3(%arg0: i32) -> (i32, i32) {
    %c0_i32 = arith.constant 0 : i32
    %c0_i32_0 = arith.constant 0 : i32
    return %arg0, %c0_i32 : i32, i32
  }
}

</mosaic_0001>

<bundles_post_ra>
// kernel: tpu_custom_call.1
= control target key start
LH: loop header
LB: loop body
LE: loop exit
PB: predicated region body
PF: predicated region fallthrough
CT: control target
= control target key end

     0   :  { %8 = vsyncpa [#allocation3], 0  ;;  %s509_s0 = inlined_call_operand.vmem [shape: f32[8,32], index: 0, kind: input, shape index: {}]   ;;  %s510_s1 = inlined_call_operand.hbm [shape: f32[8,32], index: 1, kind: input, shape index: {}]   ;;  %s511_s2 = inlined_call_operand.vmem [shape: f32[8,1], index: 2, kind: input, shape index: {}]   ;;  %s512_s3 = inlined_call_operand.hbm [shape: f32[8,8], index: 3, kind: output, shape index: {}]  }
   0x1   :  { %9 = vsyncpa [#allocation4], 0  ;;  %s17_s14 = sshll.u32 %s510_s1, 4  ;;  %s376_s15 = smov [#allocation2]   ;;  %s18_s14 = int_to_ptr.hbm [resolvable:$true] %s17_s14 }
   0x2   :  { %s19_s16 = sshll.u32 %s376_s15, 4  ;;  %s20_s16 = int_to_ptr.vmem [resolvable:$true] %s19_s16 }
   0x3   :  { %22 = dma.hbm_to_vmem [thread:$0]  %s18_s14, 128, %s20_s16, [#allocation3]  }
   0x4   :  { %372 = dma.done.wait [#allocation3], 128  }
   0x5   :  { %373 = vsyncadd [#allocation3], 4294967168  ;;  %vm63_vm0 = vcmask 261120   ;;  %v44_v0 = vld [vmem:[%s509_s0 + $0x78] sm:$0xff]  ;;  %v43_v1 = vld [vmem:[%s509_s0 + $0x70] sm:$0xff]  ;;  %v377_v21 = vmov 0  }
   0x6   :  { %v62_v2 = vmul.f32 %v44_v0, %v44_v0  ;;  %299 = vmatpush.xpose.msk.msra.mxu1 %vm63_vm0, %v44_v0  ;;  %v61_v3 = vmul.f32 %v43_v1, %v43_v1  ;;  %v42_v4 = vld [vmem:[%s509_s0 + $0x68] sm:$0xff]  ;;  %v41_v6 = vld [vmem:[%s509_s0 + $0x60] sm:$0xff]  ;;  %v40_v8 = vld [vmem:[%s509_s0 + $0x58] sm:$0xff]  ;;  %323 = vset.pattern.permute.xlu0 %v377_v21  ;;  %v378_v35 = vmov 1.0   ;;  %vm246_vm1 = vcmask 64512  }
   0x7   :  { %v60_v5 = vmul.f32 %v42_v4, %v42_v4  ;;  %v59_v7 = vmul.f32 %v41_v6, %v41_v6  ;;  %v58_v9 = vmul.f32 %v40_v8, %v40_v8  ;;  %v39_v10 = vld [vmem:[%s509_s0 + $0x50] sm:$0xff]  ;;  %v38_v12 = vld [vmem:[%s509_s0 + $0x48] sm:$0xff]  ;;  %v37_v14 = vld [vmem:[%s509_s0 + $0x40] sm:$0xff] }
   0x8   :  { %282 = vmatpush.xpose.msk.msra.mxu0 %vm63_vm0, %v62_v2  ;;  %v57_v11 = vmul.f32 %v39_v10, %v39_v10  ;;  %v56_v13 = vmul.f32 %v38_v12, %v38_v12  ;;  %v55_v15 = vmul.f32 %v37_v14, %v37_v14  ;;  %v36_v16 = vld [vmem:[%s509_s0 + $0x38] sm:$0xff]  ;;  %v35_v18 = vld [vmem:[%s509_s0 + $0x30] sm:$0xff]  ;;  %v46_v19 = vld [vmem:[%s511_s2] sm:$0xff] }
   0x9   :  { %v54_v17 = vmul.f32 %v36_v16, %v36_v16  ;;  %v53_v20 = vmul.f32 %v35_v18, %v35_v18  ;;  %v34_v22 = vld [vmem:[%s509_s0 + $0x28] sm:$0xff]  ;;  %137 = vperm.xlu0 %323, %v46_v19   ;;  %v33_v24 = vld [vmem:[%s509_s0 + $0x20] sm:$0xff]  ;;  %v32_v26 = vld [vmem:[%s509_s0 + $0x18] sm:$0xff] }
   0xa   :  { %300 = vmatpush.xpose.msk.msra.mxu1 %vm63_vm0, %v43_v1  ;;  %v52_v23 = vmul.f32 %v34_v22, %v34_v22  ;;  %v51_v25 = vmul.f32 %v33_v24, %v33_v24  ;;  %v50_v27 = vmul.f32 %v32_v26, %v32_v26  ;;  %v31_v28 = vld [vmem:[%s509_s0 + $0x10] sm:$0xff]  ;;  %v30_v30 = vld [vmem:[%s509_s0 + $0x8] sm:$0xff]  ;;  %v29_v32 = vld [vmem:[%s509_s0] sm:$0xff] }
   0xb   :  { %v49_v29 = vmul.f32 %v31_v28, %v31_v28  ;;  %v48_v31 = vmul.f32 %v30_v30, %v30_v30  ;;  %v47_v33 = vmul.f32 %v29_v32, %v29_v32  ;;  %v45_v34 = vld [vmem:[#allocation2] sm:$0xff] }
   0xc   :  { %283 = vmatpush.xpose.msk.msra.mxu0 %vm63_vm0, %v61_v3 }
   0xe   :  { %301 = vmatpush.xpose.msk.msra.mxu1 %vm63_vm0, %v42_v4 }
  0x10   :  { %284 = vmatpush.xpose.msk.msra.mxu0 %vm63_vm0, %v60_v5 }
  0x12   :  { %302 = vmatpush.xpose.msk.msra.mxu1 %vm63_vm0, %v41_v6 }
  0x14   :  { %285 = vmatpush.xpose.msk.msra.mxu0 %vm63_vm0, %v59_v7 }
  0x16   :  { %303 = vmatpush.xpose.msk.msra.mxu1 %vm63_vm0, %v40_v8 }
  0x18   :  { %286 = vmatpush.xpose.msk.msra.mxu0 %vm63_vm0, %v58_v9 }
  0x1a   :  { %304 = vmatpush.xpose.msk.msra.mxu1 %vm63_vm0, %v39_v10 }
  0x1c   :  { %287 = vmatpush.xpose.msk.msra.mxu0 %vm63_vm0, %v57_v11 }
  0x1e   :  { %305 = vmatpush.xpose.msk.msra.mxu1 %vm63_vm0, %v38_v12 }
  0x20   :  { %288 = vmatpush.xpose.msk.msra.mxu0 %vm63_vm0, %v56_v13 }
  0x22   :  { %306 = vmatpush.xpose.msk.msra.mxu1 %vm63_vm0, %v37_v14 }
  0x24   :  { %289 = vmatpush.xpose.msk.msra.mxu0 %vm63_vm0, %v55_v15 }
  0x26   :  { %307 = vmatpush.xpose.msk.msra.mxu1 %vm63_vm0, %v36_v16 }
  0x28   :  { %290 = vmatpush.xpose.msk.msra.mxu0 %vm63_vm0, %v54_v17 }
  0x2a   :  { %308 = vmatpush.xpose.msk.msra.mxu1 %vm63_vm0, %v35_v18 }
  0x2c   :  { %291 = vmatpush.xpose.msk.msra.mxu0 %vm63_vm0, %v53_v20 }
  0x2e   :  { %309 = vmatpush.xpose.msk.msra.mxu1 %vm63_vm0, %v34_v22 }
  0x30   :  { %292 = vmatpush.xpose.msk.msra.mxu0 %vm63_vm0, %v52_v23 }
  0x32   :  { %310 = vmatpush.xpose.msk.msra.mxu1 %vm63_vm0, %v33_v24 }
  0x34   :  { %293 = vmatpush.xpose.msk.msra.mxu0 %vm63_vm0, %v51_v25 }
  0x36   :  { %311 = vmatpush.xpose.msk.msra.mxu1 %vm63_vm0, %v32_v26 }
  0x38   :  { %294 = vmatpush.xpose.msk.msra.mxu0 %vm63_vm0, %v50_v27 }
  0x3a   :  { %312 = vmatpush.xpose.msk.msra.mxu1 %vm63_vm0, %v31_v28 }
  0x3c   :  { %295 = vmatpush.xpose.msk.msra.mxu0 %vm63_vm0, %v49_v29 }
  0x3e   :  { %313 = vmatpush.xpose.msk.msra.mxu1 %vm63_vm0, %v30_v30 }
  0x40   :  { %296 = vmatpush.xpose.msk.msra.mxu0 %vm63_vm0, %v48_v31 }
  0x42   :  { %314 = vmatpush.xpose.msk.msra.mxu1 %vm63_vm0, %v29_v32 }
  0x44   :  { %297 = vmatpush.xpose.msk.msra.mxu0 %vm63_vm0, %v47_v33 }
  0x45   :  { %315 = vmatmul.msk.f32.vlgmr.msra.gmra.mxu1 %vm63_vm0, %v45_v34 }
  0x47   :  { %298 = vmatmul.msk.f32.vlgmr.msra.gmra.mxu0 %vm63_vm0, %v378_v35 }
  0x7b   :  { %v138_v36 = vpop.permute.xlu0 %137 }
  0xc2   :  { %v208_v37 = vpop.f32.mrf.mxu1 }
  0xc3   :  { %v209_v38 = vadd.f32 %v208_v37, %v138_v36 }
  0xc4   :  { %v132_v39 = vpop.f32.mrf.mxu0 }
  0xc5   :  { %v211_v40 = vperm.slane %v132_v39, 0 }
  0xc7   :  { %v212_v41 = vadd.f32 %v211_v40, %v209_v38 }
  0xc9   :  { %v213_v42 = vmax.f32 %v212_v41, 0.0 }
  0xcb   :  { %214 = vxpose.xlu0.b32.start.end [1/1] (short) %v213_v42, 128 }
 0x16f   :  { %v230_v43 = vpop.trf.xlu0 }
 0x170   :  { %247 = vst.msk [vmem:[#allocation5] sm:$0xff] %vm246_vm1, %v230_v43 }
 0x177   :  { %v231_v44 = vpop.trf.xlu0 }
 0x178   :  { %248 = vst.msk [vmem:[#allocation5 + $0x8] sm:$0xff] %vm246_vm1, %v231_v44 }
 0x17f   :  { %v232_v45 = vpop.trf.xlu0 }
 0x180   :  { %249 = vst.msk [vmem:[#allocation5 + $0x10] sm:$0xff] %vm246_vm1, %v232_v45 }
 0x187   :  { %v233_v46 = vpop.trf.xlu0 }
 0x188   :  { %250 = vst.msk [vmem:[#allocation5 + $0x18] sm:$0xff] %vm246_vm1, %v233_v46 }
 0x18f   :  { %v234_v47 = vpop.trf.xlu0 }
 0x190   :  { %251 = vst.msk [vmem:[#allocation5 + $0x20] sm:$0xff] %vm246_vm1, %v234_v47 }
 0x197   :  { %v235_v48 = vpop.trf.xlu0 }
 0x198   :  { %252 = vst.msk [vmem:[#allocation5 + $0x28] sm:$0xff] %vm246_vm1, %v235_v48 }
 0x19f   :  { %v236_v49 = vpop.trf.xlu0 }
 0x1a0   :  { %253 = vst.msk [vmem:[#allocation5 + $0x30] sm:$0xff] %vm246_vm1, %v236_v49 }
 0x1a7   :  { %v237_v50 = vpop.trf.xlu0 }
 0x1a8   :  { %254 = vst.msk [vmem:[#allocation5 + $0x38] sm:$0xff] %vm246_vm1, %v237_v50 }
 0x1af   :  { %v238_v51 = vpop.trf.xlu0 }
 0x1b0   :  { %255 = vst.msk [vmem:[#allocation5 + $0x40] sm:$0xff] %vm246_vm1, %v238_v51 }
 0x1b7   :  { %v239_v52 = vpop.trf.xlu0 }
 0x1b8   :  { %256 = vst.msk [vmem:[#allocation5 + $0x48] sm:$0xff] %vm246_vm1, %v239_v52 }
 0x1bf   :  { %v240_v53 = vpop.trf.xlu0 }
 0x1c0   :  { %257 = vst.msk [vmem:[#allocation5 + $0x50] sm:$0xff] %vm246_vm1, %v240_v53 }
 0x1c7   :  { %v241_v54 = vpop.trf.xlu0 }
 0x1c8   :  { %258 = vst.msk [vmem:[#allocation5 + $0x58] sm:$0xff] %vm246_vm1, %v241_v54 }
 0x1cf   :  { %v242_v55 = vpop.trf.xlu0 }
 0x1d0   :  { %259 = vst.msk [vmem:[#allocation5 + $0x60] sm:$0xff] %vm246_vm1, %v242_v55 }
 0x1d7   :  { %v243_v56 = vpop.trf.xlu0 }
 0x1d8   :  { %260 = vst.msk [vmem:[#allocation5 + $0x68] sm:$0xff] %vm246_vm1, %v243_v56 }
 0x1df   :  { %v244_v57 = vpop.trf.xlu0 }
 0x1e0   :  { %261 = vst.msk [vmem:[#allocation5 + $0x70] sm:$0xff] %vm246_vm1, %v244_v57 }
 0x1e7   :  { %v245_v58 = vpop.trf.xlu0 }
 0x1e8   :  { %262 = vst.msk [vmem:[#allocation5 + $0x78] sm:$0xff] %vm246_vm1, %v245_v58 }
 0x1e9   :  { %266 = vsyncadd [#allocation4], 1920  ;;  %s269_s22 = sshll.u32 %s512_s3, 4  ;;  %s379_s23 = smov [#allocation5]   ;;  %s270_s22 = int_to_ptr.hbm [resolvable:$true] %s269_s22 }
 0x1ea   :  { %s267_s24 = sshll.u32 %s379_s23, 4  ;;  %s380_s25 = smov 128   ;;  %s268_s24 = int_to_ptr.vmem [resolvable:$true] %s267_s24 }
 0x1eb   :  { %s381_s26 = smov 8  }
 0x1ec   :  { %275 = dma.vmem_to_hbm [thread:$0]  %s268_s24, 128, %s270_s22, [#allocation4], %s380_s25, %s380_s25, %s381_s26  }
 0x1ed   :  { %374 = dma.done.wait [#allocation4], 2048  }
 0x1ee   :  { %375 = vsyncadd [#allocation4], 4294965248 }
 0x1ef   :  { %280 = vsyncpa [#allocation3], 1 }
 0x1f0   :  { %281 = vsyncpa [#allocation4], 1 }

</bundles_post_ra>
